<compile_context>
chip_gen: v7x
topology: tpu7x:2x2x1
jax: 0.10.0
libtpu: 0.0.40
codegen_flags: <defaults>
</compile_context>

<pallas_src>
import functools

import jax
import jax.numpy as jnp
from jax.experimental import pallas as pl
from jax.experimental.pallas import tpu as pltpu


def _disc_adv_src_kernel(x_ref, tgt_ref, w_ref, out_ref, acc_ref, *,
                         true_b, num_classes, tile_b, inner_steps):
    """Process one (tile_b, C) batch tile; accumulate a partial loss sum."""
    p = pl.program_id(0)          # parallel partition (v7x megacore split)
    t = pl.program_id(1)          # sequential accumulation axis

    @pl.when(t == 0)
    def _init():
        acc_ref[...] = jnp.zeros_like(acc_ref)

    x = x_ref[...].astype(jnp.float32)                       # (tile_b, C)

    # --- softmax pieces (full prob array never materialized) ---
    m = jnp.max(x, axis=1, keepdims=True)                    # (tile_b, 1)
    e = jnp.exp(x - m)                                       # (tile_b, C)
    denom = jnp.sum(e, axis=1, keepdims=True)                # (tile_b, 1)
    log_denom = jnp.log(denom)
    inv = pl.reciprocal(denom, approx=True)                  # EUP vrcp (cheap)

    # --- one-hot gather of target column (prob, logit, class weight) ---
    tgt = tgt_ref[...]                                       # (tile_b, 1) int32
    col = jax.lax.broadcasted_iota(jnp.int32, (tile_b, num_classes), 1)
    onehot = (col == tgt).astype(jnp.float32)                # (tile_b, C)

    e_t = jnp.sum(e * onehot, axis=1, keepdims=True)         # exp(x_t - m)
    x_t = jnp.sum(x * onehot, axis=1, keepdims=True)         # logit at target
    w = jnp.sum(w_ref[...] * onehot, axis=1, keepdims=True)  # class weight

    p_t = e_t * inv
    p_last = e[:, num_classes - 1:num_classes] * inv         # prob[:, -1]

    is_zero = e_t == 0.0                                     # p_t == 0 exactly
    is_one = jnp.logical_or(e_t == denom, p_t == 1.0)        # p_t == 1 (robust)

    # log(p_t) via log-sum-exp; log(1-p_t) via log((denom - e_t)/denom).
    # Dead branches only produce finite / -inf values that are selected away.
    log_pt = jnp.where(is_zero, jnp.log(p_t + 1e-6), (x_t - m) - log_denom)
    log_1mpt = jnp.where(is_one,
                         jnp.log(1.0 - (1.0 - 1e-6) * p_t),
                         jnp.log(denom - e_t) - log_denom)

    per_sample = w * (-log_pt * (1.0 - p_last) - log_1mpt * p_last)  # (tile_b,1)

    # mask padded rows so the mean over the true batch size stays correct
    row = (p * inner_steps + t) * tile_b + jax.lax.broadcasted_iota(
        jnp.int32, (tile_b, 1), 0)
    per_sample = jnp.where(row < true_b, per_sample, 0.0)

    acc_ref[...] += jnp.sum(per_sample).reshape(1, 1)

    @pl.when(t == inner_steps - 1)
    def _finalize():
        out_ref[...] = jnp.broadcast_to(acc_ref[...], out_ref.shape)


def _round_up(x, m):
    return ((x + m - 1) // m) * m


def _choose_tile_b(batch, num_classes):
    # target ~4 MiB f32 per logits tile, >= 8 rows, multiple of 8, <= 2048 rows
    rows = (4 * 1024 * 1024) // (max(num_classes, 128) * 4)
    rows = max(8, min(2048, (rows // 8) * 8))
    return min(rows, _round_up(batch, 8))


def disc_adv_loss_for_source_partial_da(logits, target, class_weight, *,
                                        tile_b=None):
    """logits: (B, C), target: (B,) int, class_weight: (C,) -> scalar f32 loss."""
    B, C = logits.shape
    if tile_b is None:
        tile_b = _choose_tile_b(B, C)
    tile_b = max(8, _round_up(int(tile_b), 8))

    num_tiles = pl.cdiv(B, tile_b)
    num_parallel = 2 if num_tiles >= 2 else 1      # feed both v7x TensorCores
    inner_steps = pl.cdiv(num_tiles, num_parallel)
    b_pad = num_parallel * inner_steps * tile_b

    target = target.astype(jnp.int32)
    if b_pad != B:
        logits = jnp.pad(logits, ((0, b_pad - B), (0, 0)))
        target = jnp.pad(target, (0, b_pad - B))
    tgt2 = target.reshape(b_pad, 1)
    w2 = class_weight.reshape(1, C).astype(jnp.float32)

    kernel = functools.partial(
        _disc_adv_src_kernel, true_b=B, num_classes=C,
        tile_b=tile_b, inner_steps=inner_steps)

    out = pl.pallas_call(
        kernel,
        out_shape=jax.ShapeDtypeStruct((num_parallel * 8, 128), jnp.float32),
        grid=(num_parallel, inner_steps),
        in_specs=[
            pl.BlockSpec((tile_b, C), lambda p, t: (p * inner_steps + t, 0)),
            pl.BlockSpec((tile_b, 1), lambda p, t: (p * inner_steps + t, 0)),
            pl.BlockSpec((1, C), lambda p, t: (0, 0)),
        ],
        out_specs=pl.BlockSpec((8, 128), lambda p, t: (p, 0)),
        scratch_shapes=[pltpu.VMEM((1, 1), jnp.float32)],
        compiler_params=pltpu.CompilerParams(
            dimension_semantics=("parallel", "arbitrary"),
            vmem_limit_bytes=32 * 1024 * 1024),
    )(logits, tgt2, w2)

    partials = out[0::8, 0]                        # one partial sum per partition
    return jnp.sum(partials) / jnp.float32(B)


def _reference(logits, target, class_weight):
    """Pure-JAX reference mirroring the PyTorch loop."""
    prob = jax.nn.softmax(logits.astype(jnp.float32), axis=1)
    B = logits.shape[0]
    total = 0.0
    for i in range(B):
        ti = int(target[i])
        p_t = prob[i, ti]
        p_last = prob[i, -1]
        w = class_weight[ti]
        if p_t == 1.0:
            li = w * (-jnp.log(p_t) * (1 - p_last)
                      - jnp.log(1 - (1 - 1e-6) * p_t) * p_last)
        elif p_t == 0.0:
            li = w * (-jnp.log(p_t + 1e-6) * (1 - p_last)
                      - jnp.log(1 - p_t) * p_last)
        else:
            li = w * (-jnp.log(p_t) * (1 - p_last)
                      - jnp.log(1 - p_t) * p_last)
        total = total + li
    return total / B


if __name__ == "__main__":
    key = jax.random.PRNGKey(0)
    k1, k2, k3 = jax.random.split(key, 3)

    B, C = 20, 8  # 20 samples, 8 columns (last column = "unknown/source" prob)
    logits = jax.random.normal(k1, (B, C), dtype=jnp.float32) * 2.0
    target = jax.random.randint(k2, (B,), 0, C - 1, dtype=jnp.int32)
    class_weight = jax.random.uniform(k3, (C,), dtype=jnp.float32,
                                      minval=0.5, maxval=1.5)

    ref = _reference(logits, target, class_weight)

    # default tiling: single tile per partition, padded rows masked out
    loss = jax.block_until_ready(
        disc_adv_loss_for_source_partial_da(logits, target, class_weight))
    # tolerance accounts for the approximate EUP reciprocal / LSE refactor
    assert jnp.allclose(loss, ref, rtol=1e-3, atol=1e-3), (loss, ref)

    # small tiles: exercises the (parallel, arbitrary) grid, accumulation,
    # cross-tile masking and the multi-partition output path
    loss_tiled = jax.block_until_ready(
        disc_adv_loss_for_source_partial_da(logits, target, class_weight,
                                            tile_b=8))
    assert jnp.allclose(loss_tiled, ref, rtol=1e-3, atol=1e-3), (loss_tiled, ref)

    print("KERNEL_OK")
</pallas_src>

<mosaic_0001>
module attributes {stable_mosaic.version = 11 : i64} {
  func.func @_disc_adv_src_kernel(%arg0: i32, %arg1: i32, %arg2: memref<24x8xf32, #tpu.memory_space<vmem>>, %arg3: memref<24x1xi32, #tpu.memory_space<vmem>>, %arg4: memref<1x8xf32, #tpu.memory_space<vmem>>, %arg5: memref<8x128xf32, #tpu.memory_space<vmem>>, %arg6: memref<1x1xf32, #tpu.memory_space<vmem>>) attributes {dimension_semantics = [#tpu.dimension_semantics<parallel>, #tpu.dimension_semantics<arbitrary>], iteration_bounds = array<i64: 1, 1>, scalar_prefetch = 0 : i64, scratch_operands = 1 : i64, tpu.core_type = #tpu.core_type<tc>, window_params = [{transform_indices = @transform_0, window_bounds = array<i64: 24, 8>}, {transform_indices = @transform_1, window_bounds = array<i64: 24, 1>}, {pipeline_mode = #tpu.pipeline_mode<synchronous>, transform_indices = @transform_2, window_bounds = array<i64: 1, 8>}, {transform_indices = @transform_3, window_bounds = array<i64: 8, 128>}]} {
    %c0_i32 = arith.constant 0 : i32
    %0 = arith.cmpi eq, %arg1, %c0_i32 : i32
    %1 = arith.extui %0 : i1 to i32
    %c0_i32_0 = arith.constant 0 : i32
    %2 = arith.cmpi ne, %1, %c0_i32_0 : i32
    scf.if %2 {
      %cst_25 = arith.constant 0.000000e+00 : f32
      %83 = vector.broadcast %cst_25 : f32 to vector<1x1xf32>
      %c0_26 = arith.constant 0 : index
      %c0_27 = arith.constant 0 : index
      %84 = vector.load %arg6[%c0_26, %c0_27] : memref<1x1xf32, #tpu.memory_space<vmem>>, vector<1x1xf32>
      tpu.vector_store %arg6[%c0_26, %c0_27], %83 {strides = array<i32>} : memref<1x1xf32, #tpu.memory_space<vmem>>, vector<1x1xf32>,
    } else {
    }
    %c0 = arith.constant 0 : index
    %c0_1 = arith.constant 0 : index
    %3 = vector.load %arg2[%c0, %c0_1] : memref<24x8xf32, #tpu.memory_space<vmem>>, vector<24x8xf32>
    %cst = arith.constant dense<0xFF800000> : vector<24xf32>
    %4 = vector.multi_reduction <maximumf>, %3, %cst [1] : vector<24x8xf32> to vector<24xf32>
    %5 = vector.shape_cast %4 : vector<24xf32> to vector<24x1xf32>
    %6 = vector.broadcast %5 : vector<24x1xf32> to vector<24x8xf32>
    %7 = arith.subf %3, %6 : vector<24x8xf32>
    %8 = math.exp %7 : vector<24x8xf32>
    %cst_2 = arith.constant dense<0.000000e+00> : vector<24xf32>
    %9 = vector.multi_reduction <add>, %8, %cst_2 [1] : vector<24x8xf32> to vector<24xf32>
    %10 = vector.shape_cast %9 : vector<24xf32> to vector<24x1xf32>
    %11 = math.log %10 : vector<24x1xf32>
    %12 = tpu.reciprocal %10 {approx = true} : vector<24x1xf32> -> vector<24x1xf32>
    %c0_3 = arith.constant 0 : index
    %c0_4 = arith.constant 0 : index
    %13 = vector.load %arg3[%c0_3, %c0_4] : memref<24x1xi32, #tpu.memory_space<vmem>>, vector<24x1xi32>
    %14 = tpu.iota {dimensions = array<i32: 1>} : vector<24x8xi32>
    %15 = vector.broadcast %13 : vector<24x1xi32> to vector<24x8xi32>
    %16 = arith.cmpi eq, %14, %15 : vector<24x8xi32>
    %17 = arith.extui %16 : vector<24x8xi1> to vector<24x8xi32>
    %18 = arith.sitofp %17 : vector<24x8xi32> to vector<24x8xf32>
    %19 = arith.mulf %8, %18 : vector<24x8xf32>
    %cst_5 = arith.constant dense<0.000000e+00> : vector<24xf32>
    %20 = vector.multi_reduction <add>, %19, %cst_5 [1] : vector<24x8xf32> to vector<24xf32>
    %21 = vector.shape_cast %20 : vector<24xf32> to vector<24x1xf32>
    %22 = arith.mulf %3, %18 : vector<24x8xf32>
    %cst_6 = arith.constant dense<0.000000e+00> : vector<24xf32>
    %23 = vector.multi_reduction <add>, %22, %cst_6 [1] : vector<24x8xf32> to vector<24xf32>
    %24 = vector.shape_cast %23 : vector<24xf32> to vector<24x1xf32>
    %c0_7 = arith.constant 0 : index
    %c0_8 = arith.constant 0 : index
    %25 = vector.load %arg4[%c0_7, %c0_8] : memref<1x8xf32, #tpu.memory_space<vmem>>, vector<1x8xf32>
    %26 = vector.broadcast %25 : vector<1x8xf32> to vector<24x8xf32>
    %27 = arith.mulf %26, %18 : vector<24x8xf32>
    %cst_9 = arith.constant dense<0.000000e+00> : vector<24xf32>
    %28 = vector.multi_reduction <add>, %27, %cst_9 [1] : vector<24x8xf32> to vector<24xf32>
    %29 = vector.shape_cast %28 : vector<24xf32> to vector<24x1xf32>
    %30 = arith.mulf %21, %12 : vector<24x1xf32>
    %31 = vector.extract_strided_slice %8 {offsets = [0, 7], sizes = [24, 1], strides = [1, 1]} : vector<24x8xf32> to vector<24x1xf32>
    %32 = arith.mulf %31, %12 : vector<24x1xf32>
    %cst_10 = arith.constant 0.000000e+00 : f32
    %33 = vector.broadcast %cst_10 : f32 to vector<24x1xf32>
    %34 = arith.cmpf oeq, %21, %33 : vector<24x1xf32>
    %35 = arith.cmpf oeq, %21, %10 : vector<24x1xf32>
    %cst_11 = arith.constant 1.000000e+00 : f32
    %36 = vector.broadcast %cst_11 : f32 to vector<24x1xf32>
    %37 = arith.cmpf oeq, %30, %36 : vector<24x1xf32>
    %38 = arith.ori %35, %37 : vector<24x1xi1>
    %cst_12 = arith.constant 9.99999997E-7 : f32
    %39 = vector.broadcast %cst_12 : f32 to vector<24x1xf32>
    %40 = arith.addf %30, %39 : vector<24x1xf32>
    %41 = math.log %40 : vector<24x1xf32>
    %42 = arith.subf %24, %5 : vector<24x1xf32>
    %43 = arith.subf %42, %11 : vector<24x1xf32>
    %44 = arith.select %34, %41, %43 : vector<24x1xi1>, vector<24x1xf32>
    %cst_13 = arith.constant 0.999998986 : f32
    %45 = vector.broadcast %cst_13 : f32 to vector<24x1xf32>
    %46 = arith.mulf %45, %30 : vector<24x1xf32>
    %cst_14 = arith.constant 1.000000e+00 : f32
    %47 = vector.broadcast %cst_14 : f32 to vector<24x1xf32>
    %48 = arith.subf %47, %46 : vector<24x1xf32>
    %49 = math.log %48 : vector<24x1xf32>
    %50 = arith.subf %10, %21 : vector<24x1xf32>
    %51 = math.log %50 : vector<24x1xf32>
    %52 = arith.subf %51, %11 : vector<24x1xf32>
    %53 = arith.select %38, %49, %52 : vector<24x1xi1>, vector<24x1xf32>
    %cst_15 = arith.constant 0.000000e+00 : f32
    %54 = vector.broadcast %cst_15 : f32 to vector<24x1xf32>
    %55 = arith.subf %54, %44 : vector<24x1xf32>
    %cst_16 = arith.constant 1.000000e+00 : f32
    %56 = vector.broadcast %cst_16 : f32 to vector<24x1xf32>
    %57 = arith.subf %56, %32 : vector<24x1xf32>
    %58 = arith.mulf %55, %57 : vector<24x1xf32>
    %59 = arith.mulf %53, %32 : vector<24x1xf32>
    %60 = arith.subf %58, %59 : vector<24x1xf32>
    %61 = arith.mulf %29, %60 : vector<24x1xf32>
    %c1_i32 = arith.constant 1 : i32
    %62 = arith.muli %arg0, %c1_i32 : i32
    %63 = arith.addi %62, %arg1 : i32
    %c24_i32 = arith.constant 24 : i32
    %64 = arith.muli %63, %c24_i32 : i32
    %65 = tpu.iota {dimensions = array<i32: 0>} : vector<24x1xi32>
    %66 = vector.broadcast %64 : i32 to vector<24x1xi32>
    %67 = arith.addi %66, %65 : vector<24x1xi32>
    %c20_i32 = arith.constant 20 : i32
    %68 = vector.broadcast %c20_i32 : i32 to vector<24x1xi32>
    %69 = arith.cmpi slt, %67, %68 : vector<24x1xi32>
    %cst_17 = arith.constant 0.000000e+00 : f32
    %70 = vector.broadcast %cst_17 : f32 to vector<24x1xf32>
    %71 = arith.select %69, %61, %70 : vector<24x1xi1>, vector<24x1xf32>
    %c0_18 = arith.constant 0 : index
    %c0_19 = arith.constant 0 : index
    %72 = vector.load %arg6[%c0_18, %c0_19] : memref<1x1xf32, #tpu.memory_space<vmem>>, vector<1x1xf32>
    %73 = vector.shape_cast %71 : vector<24x1xf32> to vector<1x24x1xf32>
    %cst_20 = arith.constant dense<0.000000e+00> : vector<1xf32>
    %74 = vector.multi_reduction <add>, %73, %cst_20 [1, 2] : vector<1x24x1xf32> to vector<1xf32>
    %75 = vector.shape_cast %74 : vector<1xf32> to vector<1x1x1xf32>
    %76 = vector.extract %75[0, 0, 0] : f32 from vector<1x1x1xf32>
    %77 = vector.broadcast %76 : f32 to vector<1x1xf32>
    %78 = arith.addf %72, %77 : vector<1x1xf32>
    %c0_21 = arith.constant 0 : index
    %c0_22 = arith.constant 0 : index
    %79 = vector.load %arg6[%c0_21, %c0_22] : memref<1x1xf32, #tpu.memory_space<vmem>>, vector<1x1xf32>
    tpu.vector_store %arg6[%c0_21, %c0_22], %78 {strides = array<i32>} : memref<1x1xf32, #tpu.memory_space<vmem>>, vector<1x1xf32>,
    %c0_i32_23 = arith.constant 0 : i32
    %80 = arith.cmpi eq, %arg1, %c0_i32_23 : i32
    %81 = arith.extui %80 : i1 to i32
    %c0_i32_24 = arith.constant 0 : i32
    %82 = arith.cmpi ne, %81, %c0_i32_24 : i32
    scf.if %82 {
      %c0_25 = arith.constant 0 : index
      %c0_26 = arith.constant 0 : index
      %83 = vector.load %arg6[%c0_25, %c0_26] : memref<1x1xf32, #tpu.memory_space<vmem>>, vector<1x1xf32>
      %84 = vector.shape_cast %83 : vector<1x1xf32> to vector<1x1xf32>
      %85 = vector.broadcast %84 : vector<1x1xf32> to vector<8x128xf32>
      %c0_27 = arith.constant 0 : index
      %c0_28 = arith.constant 0 : index
      %86 = vector.load %arg5[%c0_27, %c0_28] : memref<8x128xf32, #tpu.memory_space<vmem>>, vector<8x128xf32>
      tpu.vector_store %arg5[%c0_27, %c0_28], %85 {strides = array<i32>} : memref<8x128xf32, #tpu.memory_space<vmem>>, vector<8x128xf32>,
    } else {
    }
    return
  }
  func.func @transform_0(%arg0: i32, %arg1: i32) -> (i32, i32) {
    %c1_i32 = arith.constant 1 : i32
    %0 = arith.muli %arg0, %c1_i32 : i32
    %1 = arith.addi %0, %arg1 : i32
    %c0_i32 = arith.constant 0 : i32
    %c0_i32_0 = arith.constant 0 : i32
    return %1, %c0_i32 : i32, i32
  }
  func.func @transform_1(%arg0: i32, %arg1: i32) -> (i32, i32) {
    %c1_i32 = arith.constant 1 : i32
    %0 = arith.muli %arg0, %c1_i32 : i32
    %1 = arith.addi %0, %arg1 : i32
    %c0_i32 = arith.constant 0 : i32
    %c0_i32_0 = arith.constant 0 : i32
    return %1, %c0_i32 : i32, i32
  }
  func.func @transform_2(%arg0: i32, %arg1: i32) -> (i32, i32) {
    %c0_i32 = arith.constant 0 : i32
    %c0_i32_0 = arith.constant 0 : i32
    %c0_i32_1 = arith.constant 0 : i32
    return %c0_i32, %c0_i32_0 : i32, i32
  }
  func.func @transform_3(%arg0: i32, %arg1: i32) -> (i32, i32) {
    %c0_i32 = arith.constant 0 : i32
    %c0_i32_0 = arith.constant 0 : i32
    return %arg0, %c0_i32 : i32, i32
  }
}

</mosaic_0001>

<bundles_post_ra>
// kernel: tpu_custom_call.1
= control target key start
LH: loop header
LB: loop body
LE: loop exit
PB: predicated region body
PF: predicated region fallthrough
CT: control target
= control target key end

     0   :  { %vm68_vm0 = vcmask 64512   ;;  %v413_v5 = vmov 0   ;;  %s597_s0 = inlined_call_operand.vmem [shape: f32[24,8], index: 0, kind: input, shape index: {}]   ;;  %s598_s1 = inlined_call_operand.vmem [shape: s32[24,1], index: 1, kind: input, shape index: {}]   ;;  %s599_s2 = inlined_call_operand.vmem [shape: f32[1,8], index: 2, kind: input, shape index: {}]   ;;  %s600_s3 = inlined_call_operand.hbm [shape: f32[8,128], index: 3, kind: output, shape index: {}]  }
   0x1   :  { %v440_v0 = vld [vmem:[%s597_s0] sm:$0xff]  ;;  %v67_v1 = vld [vmem:[%s597_s0 + $0x10] sm:$0xff]  ;;  %v448_v2 = vld [vmem:[%s597_s0 + $0x8] sm:$0xff]  ;;  %351 = vset.pattern.permute.xlu1 %v413_v5  ;;  %352 = vset.pattern.permute.xlu0 %v413_v5 }
   0x2   :  { %v69_v3 = vsel %vm68_vm0, %v440_v0, -inf  ;;  %v75_v4 = vsel %vm68_vm0, %v67_v1, -inf }
   0x3   :  { %70 = vmax.xlane.f32.xlu0 %v69_v3  ;;  %76 = vmax.xlane.f32.xlu1 %v75_v4 }
   0x4   :  { %8 = vsyncpa [#allocation4], 0  ;;  %v72_v6 = vsel %vm68_vm0, %v448_v2, -inf  ;;  %v105_v7 = vld [vmem:[%s598_s1] sm:$0xff]  ;;  %v107_v8 = vld [vmem:[%s598_s1 + $0x10] sm:$0xff]  ;;  %vm63_vm1 = vcmask 0   ;;  %v108_v20 = vlaneseq }
   0x5   :  { %v106_v9 = vld [vmem:[%s598_s1 + $0x8] sm:$0xff]  ;;  %v414_v10 = vmov 0.0   ;;  %v343_v36 = vld [vmem:[%s599_s2] ss:$0 sm:$0xff]  ;;  %s415_s2 = smov 121   ;;  %s416_s25 = smov [#allocation3]  }
   0x6   :  { %64 = vst.msk [vmem:[#allocation2] sm:$0x1] %vm63_vm1, %v414_v10  ;;  %v109_v23 = vand.u32 127, %v108_v20  ;;  %s320_s26 = sshll.u32 %s416_s25, 4  ;;  %s321_s26 = int_to_ptr.vmem [resolvable:$true] %s320_s26 }
   0x7   :  { %73 = vmax.xlane.f32.xlu0 %v72_v6  ;;  %s389_s27 = scalar_lea.vmem %s321_s26, 128  ;;  %p394_p1 = scmp.lt.s32.totalorder %s321_s26, %s321_s26 }
   0x8   :  { %p390_p0 = scmp.ne.s32.totalorder %s321_s26, %s389_s27  ;;  %p395_p2 = scmp.lt.s32.totalorder %s389_s27, %s389_s27 }
   0xa   :  { %p396_p3 = por %p395_p2, %p394_p1 }
   0xc   :  { %p397_p4 = pnand %p396_p3, %p390_p0 }
  0x14   :  { %111 = vperm.xlu1 %351, %v105_v7  }
  0x18   :  { %117 = vperm.xlu1 %351, %v107_v8  }
  0x1d   :  { %114 = vperm.xlu0 %352, %v106_v9  }
  0x90   :  { %v465_v11 = vpop.xlane.xlu0 %70  ;;  %v467_v12 = vpop.xlane.xlu1 %76 }
  0x91   :  { %v78_v13 = vsub.f32 %v440_v0, %v465_v11  ;;  %v80_v14 = vsub.f32 %v67_v1, %v467_v12 }
  0x93   :  { %v81_v15 = vmul.f32 1.442695, %v78_v13  ;;  %v85_v16 = vmul.f32 1.442695, %v80_v14 }
  0x94   :  { %v472_v17 = vpop.xlane.xlu0 %73  ;;  %v112_v19 = vpop.permute.xlu1 %111 }
  0x95   :  { %353 = vpow2.f32 %v81_v15  ;;  %v79_v18 = vsub.f32 %v448_v2, %v472_v17  ;;  %vm119_vm3 = vcmp.eq.s32.totalorder %v109_v23, %v112_v19 }
  0x96   :  { %355 = vpow2.f32 %v85_v16  ;;  %v340_v29 = vsel %vm119_vm3, 1.0, %v414_v10  ;;  %vm281_vm3 = vcmask 7168  }
  0x97   :  { %v83_v21 = vmul.f32 1.442695, %v79_v18  ;;  %v140_v45 = vmul.f32 %v340_v29, %v440_v0  ;;  %v159_v49 = vmul.f32 %v343_v36, %v340_v29 }
  0x98   :  { %v118_v22 = vpop.permute.xlu1 %117 }
  0x99   :  { %357 = vpow2.f32 %v83_v21  ;;  %vm121_vm2 = vcmp.eq.s32.totalorder %v109_v23, %v118_v22  ;;  %v143_v46 = vsel %vm68_vm0, %v140_v45, 0.0  ;;  %v162_v50 = vsel %vm68_vm0, %v159_v49, 0.0 }
  0x9a   :  { %v342_v26 = vsel %vm121_vm2, 1.0, %v414_v10 }
  0x9b   :  { %v142_v31 = vmul.f32 %v342_v26, %v67_v1  ;;  %v161_v51 = vmul.f32 %v343_v36, %v342_v26 }
  0x9c   :  { %v115_v25 = vpop.permute.xlu0 %114 }
  0x9d   :  { %vm120_vm4 = vcmp.eq.s32.totalorder %v109_v23, %v115_v25  ;;  %v149_v37 = vsel %vm68_vm0, %v142_v31, 0.0  ;;  %v168_v52 = vsel %vm68_vm0, %v161_v51, 0.0 }
  0x9e   :  { %v341_v35 = vsel %vm120_vm4, 1.0, %v414_v10 }
  0x9f   :  { %v477_v24 = vpop.eup %353  ;;  %v160_v38 = vmul.f32 %v343_v36, %v341_v35  ;;  %v141_v47 = vmul.f32 %v341_v35, %v448_v2 }
  0xa0   :  { %v479_v27 = vpop.eup %355  ;;  %v87_v28 = vsel %vm68_vm0, %v477_v24, 0.0  ;;  %v128_v34 = vmul.f32 %v477_v24, %v340_v29 }
  0xa1   :  { %88 = vadd.xlane.f32.xlu1 %v87_v28  ;;  %v93_v30 = vsel %vm68_vm0, %v479_v27, 0.0  ;;  %v165_v41 = vsel %vm68_vm0, %v160_v38, 0.0  ;;  %v130_v43 = vmul.f32 %v479_v27, %v342_v26  ;;  %v146_v48 = vsel %vm68_vm0, %v141_v47, 0.0 }
  0xa2   :  { %v131_v39 = vsel %vm68_vm0, %v128_v34, 0.0 }
  0xa3   :  { %v485_v32 = vpop.eup %357  ;;  %v137_v44 = vsel %vm68_vm0, %v130_v43, 0.0 }
  0xa4   :  { %v90_v33 = vsel %vm68_vm0, %v485_v32, 0.0  ;;  %v129_v40 = vmul.f32 %v485_v32, %v341_v35 }
  0xa5   :  { %94 = vadd.xlane.f32.xlu1 %v93_v30  ;;  %91 = vadd.xlane.f32.xlu0 %v90_v33  ;;  %v546_v30 = vshrl.u32 %v108_v20, 7 }
  0xa6   :  { %v134_v42 = vsel %vm68_vm0, %v129_v40, 0.0 }
  0xa9   :  { %150 = vadd.xlane.f32.xlu0 %v149_v37  ;;  %132 = vadd.xlane.f32.xlu1 %v131_v39 }
  0xad   :  { %135 = vadd.xlane.f32.xlu1 %v134_v42  ;;  %166 = vadd.xlane.f32.xlu0 %v165_v41 }
  0xb1   :  { %138 = vadd.xlane.f32.xlu1 %v137_v44 }
  0xb5   :  { %144 = vadd.xlane.f32.xlu1 %v143_v46 }
  0xb9   :  { %147 = vadd.xlane.f32.xlu1 %v146_v48 }
  0xbd   :  { %163 = vadd.xlane.f32.xlu1 %v162_v50 }
  0xc1   :  { %169 = vadd.xlane.f32.xlu1 %v168_v52 }
 0x12e   :  { %v506_v53 = vpop.xlane.xlu1 %88 }
 0x12f   :  { %359 = vrcp.f32 %v506_v53 }
 0x132   :  { %v509_v54 = vpop.xlane.xlu1 %94  ;;  %v511_v55 = vpop.xlane.xlu0 %91 }
 0x133   :  { %361 = vrcp.f32 %v509_v54 }
 0x134   :  { %363 = vrcp.f32 %v511_v55 }
 0x135   :  { %365 = vlog2.f32 %v506_v53 }
 0x136   :  { %v515_v56 = vpop.xlane.xlu1 %132  ;;  %367 = vlog2.f32 %v509_v54  ;;  %v151_v21 = vpop.xlane.xlu0 %150 }
 0x137   :  { %v219_v57 = vsub.f32 %v506_v53, %v515_v56  ;;  %v200_v33 = vsub.f32 %v151_v21, %v467_v12  ;;  %vm177_vm5 = vcmp.eq.f32.partialorder %v515_v56, 0.0  ;;  %vm180_vm6 = vcmp.eq.f32.partialorder %v515_v56, %v506_v53 }
 0x139   :  { %v360_v58 = vpop.eup %359  ;;  %369 = vlog2.f32 %v219_v57 }
 0x13a   :  { %v521_v59 = vpop.xlane.xlu1 %135  ;;  %v171_v60 = vmul.f32 %v360_v58, %v515_v56  ;;  %371 = vlog2.f32 %v511_v55  ;;  %v174_v25 = vmul.f32 %v360_v58, %v477_v24 }
 0x13b   :  { %v220_v61 = vsub.f32 %v511_v55, %v521_v59  ;;  %vm178_vm7 = vcmp.eq.f32.partialorder %v521_v59, 0.0  ;;  %vm181_vm9 = vcmp.eq.f32.partialorder %v521_v59, %v511_v55 }
 0x13c   :  { %v189_v62 = vadd.f32 1e-06, %v171_v60  ;;  %v207_v63 = vmul.f32 0.999999, %v171_v60  ;;  %vm183_vm8 = vcmp.eq.f32.partialorder %v171_v60, 1.0  ;;  %v237_v12 = vsub.f32 1.0, %v174_v25 }
 0x13d   :  { %v362_v0 = vpop.eup %361  ;;  %vm186_vm11 = vmor %vm180_vm6, %vm183_vm8 }
 0x13e   :  { %v527_v1 = vpop.xlane.xlu1 %138  ;;  %373 = vlog2.f32 %v189_v62  ;;  %v210_v2 = vsub.f32 1.0, %v207_v63  ;;  %v364_v4 = vpop.eup %363  ;;  %v176_v37 = vmul.f32 %v362_v0, %v479_v27 }
 0x13f   :  { %v530_v3 = vmul.f32 %v362_v0, %v527_v1  ;;  %375 = vlog2.f32 %v220_v61  ;;  %v221_v5 = vsub.f32 %v509_v54, %v527_v1  ;;  %v535_v6 = vmul.f32 %v364_v4, %v521_v59  ;;  %v366_v9 = vpop.eup %365 }
 0x140   :  { %377 = vlog2.f32 %v210_v2  ;;  %v368_v15 = vpop.eup %367  ;;  %v97_v28 = vmul.f32 0.6931472, %v366_v9  ;;  %vm179_vm10 = vcmp.eq.f32.partialorder %v527_v1, 0.0  ;;  %vm182_vm12 = vcmp.eq.f32.partialorder %v527_v1, %v509_v54 }
 0x141   :  { %v191_v7 = vadd.f32 1e-06, %v530_v3  ;;  %v209_v8 = vmul.f32 0.999999, %v530_v3  ;;  %379 = vlog2.f32 %v221_v5  ;;  %v190_v10 = vadd.f32 1e-06, %v535_v6 }
 0x142   :  { %v208_v13 = vmul.f32 0.999999, %v535_v6  ;;  %v145_v14 = vpop.xlane.xlu1 %144  ;;  %v542_v23 = vmul.f32 0.6931472, %v368_v15  ;;  %vm184_vm13 = vcmp.eq.f32.partialorder %v535_v6, 1.0  ;;  %vm185_vm14 = vcmp.eq.f32.partialorder %v530_v3, 1.0 }
 0x143   :  { %381 = vlog2.f32 %v191_v7  ;;  %v212_v16 = vsub.f32 1.0, %v209_v8  ;;  %v370_v18 = vpop.eup %369  ;;  %v198_v22 = vsub.f32 %v145_v14, %v465_v11  ;;  %v239_v58 = vsub.f32 1.0, %v176_v37  ;;  %vm188_vm15 = vmor %vm182_vm12, %vm185_vm14 }
 0x144   :  { %383 = vlog2.f32 %v190_v10  ;;  %v211_v19 = vsub.f32 1.0, %v208_v13  ;;  %v372_v26 = vpop.eup %371  ;;  %v223_v29 = vmul.f32 0.6931472, %v370_v18  ;;  %v203_v36 = vsub.f32 %v200_v33, %v542_v23  ;;  %vm187_vm0 = vmor %vm181_vm9, %vm184_vm13 }
 0x145   :  { %385 = vlog2.f32 %v212_v16  ;;  %v201_v24 = vsub.f32 %v198_v22, %v97_v28  ;;  %v99_v45 = vmul.f32 0.6931472, %v372_v26  ;;  %v257_v18 = vadd.s32 16, %v546_v30 }
 0x146   :  { %387 = vlog2.f32 %v211_v19  ;;  %v148_v11 = vpop.xlane.xlu1 %147  ;;  %v228_v39 = vsub.f32 %v223_v29, %v97_v28  ;;  %v167_v19 = vpop.xlane.xlu0 %166 }
 0x147   :  { %v199_v40 = vsub.f32 %v148_v11, %v472_v17  ;;  %v175_v17 = vmul.f32 %v364_v4, %v485_v32  ;;  %vm264_vm2 = vcmp.lt.s32.totalorder %v257_v18, 20 }
 0x148   :  { %v374_v31 = vpop.eup %373 }
 0x149   :  { %v376_v34 = vpop.eup %375  ;;  %v193_v35 = vmul.f32 0.6931472, %v374_v31  ;;  %v202_v56 = vsub.f32 %v199_v40, %v99_v45  ;;  %v238_v5 = vsub.f32 1.0, %v175_v17 }
 0x14a   :  { %v378_v20 = vpop.eup %377  ;;  %v225_v46 = vmul.f32 0.6931472, %v376_v34  ;;  %v164_v3 = vpop.xlane.xlu1 %163 }
 0x14b   :  { %v380_v38 = vpop.eup %379  ;;  %v204_v41 = vsel %vm177_vm5, %v193_v35, %v201_v24  ;;  %v214_v42 = vmul.f32 0.6931472, %v378_v20 }
 0x14c   :  { %v227_v44 = vmul.f32 0.6931472, %v380_v38  ;;  %v234_v27 = vsub.f32 0.0, %v204_v41  ;;  %v229_v0 = vsub.f32 %v225_v46, %v99_v45 }
 0x14d   :  { %v382_v43 = vpop.eup %381  ;;  %v231_v47 = vsel %vm186_vm11, %v214_v42, %v228_v39 }
 0x14e   :  { %v197_v48 = vmul.f32 0.6931472, %v382_v43  ;;  %v384_v49 = vpop.eup %383  ;;  %v240_v50 = vmul.f32 %v237_v12, %v234_v27  ;;  %v243_v51 = vmul.f32 %v231_v47, %v174_v25  ;;  %v230_v63 = vsub.f32 %v227_v44, %v542_v23  ;;  %v170_v6 = vpop.xlane.xlu1 %169  ;;  %v268_v12 = vld [vmem:[#allocation2] sm:$0x1] }
 0x14f   :  { %v386_v52 = vpop.eup %385  ;;  %v195_v53 = vmul.f32 0.6931472, %v384_v49 }
 0x150   :  { %v206_v57 = vsel %vm179_vm10, %v197_v48, %v203_v36  ;;  %v388_v60 = vpop.eup %387  ;;  %v246_v61 = vsub.f32 %v240_v50, %v243_v51  ;;  %v218_v62 = vmul.f32 0.6931472, %v386_v52 }
 0x151   :  { %v236_v32 = vsub.f32 0.0, %v206_v57  ;;  %v205_v2 = vsel %vm178_vm7, %v195_v53, %v202_v56  ;;  %v216_v4 = vmul.f32 0.6931472, %v388_v60 }
 0x152   :  { %v235_v7 = vsub.f32 0.0, %v205_v2  ;;  %v249_v8 = vmul.f32 %v246_v61, %v164_v3  ;;  %v233_v9 = vsel %vm188_vm15, %v218_v62, %v230_v63 }
 0x153   :  { %v242_v10 = vmul.f32 %v239_v58, %v236_v32  ;;  %v245_v13 = vmul.f32 %v233_v9, %v176_v37  ;;  %v232_v54 = vsel %vm187_vm0, %v216_v4, %v229_v0 }
 0x154   :  { %272 = vrot.lane.b32.xlu0 %v249_v8, %s415_s2  ;;  %v241_v1 = vmul.f32 %v238_v5, %v235_v7  ;;  %v244_v14 = vmul.f32 %v232_v54, %v175_v17 }
 0x155   :  { %v248_v15 = vsub.f32 %v242_v10, %v245_v13 }
 0x156   :  { %v247_v16 = vsub.f32 %v241_v1, %v244_v14 }
 0x157   :  { %v251_v22 = vmul.f32 %v248_v15, %v170_v6 }
 0x158   :  { %v250_v21 = vmul.f32 %v247_v16, %v167_v19 }
 0x159   :  { %v267_v55 = vsel %vm264_vm2, %v251_v22, 0.0 }
 0x15a   :  { %274 = vrot.lane.b32.xlu1 %v250_v21, %s415_s2 }
 0x15e   :  { %276 = vrot.lane.b32.xlu1 %v267_v55, %s415_s2 }
 0x1c6   :  { %v273_v59 = vpop.permute.xlu0 %272 }
 0x1c7   :  { %v282_v26 = vsel %vm281_vm3, %v273_v59, 0.0 }
 0x1cc   :  { %v275_v23 = vpop.permute.xlu1 %274 }
 0x1cd   :  { %v283_v25 = vsel %vm281_vm3, %v275_v23, 0.0 }
 0x1ce   :  { %v284_v28 = vadd.f32 %v283_v25, %v282_v26 }
 0x1d0   :  { %v277_v29 = vpop.permute.xlu1 %276 }
 0x1d1   :  { %v285_v31 = vsel %vm281_vm3, %v277_v29, 0.0 }
 0x1d2   :  { %v286_v33 = vadd.f32 %v285_v31, %v284_v28 }
 0x1d4   :  { %287 = vadd.xlane.f32.xlu0 %v286_v33 }
 0x261   :  { %v288_v11 = vpop.xlane.xlu0 %287 }
 0x262   :  { %v289_v30 = vrot.slane %v288_v11, 4 }
 0x264   :  { %v290_v34 = vadd.f32 %v289_v30, %v288_v11 }
 0x266   :  { %v291_v24 = vrot.slane %v290_v34, 2 }
 0x268   :  { %v292_v35 = vadd.f32 %v291_v24, %v290_v34 }
 0x26a   :  { %v293_v20 = vrot.slane %v292_v35, 1 }
 0x26c   :  { %v294_v36 = vadd.f32 %v293_v20, %v292_v35 }
 0x26e   :  { %345 = vpush %v294_v36 }
 0x29f   :  { %s346_s24 = spop %345 }
 0x2a0   :  { %v296_v37 = vstv %s346_s24 }
 0x2a1   :  { %v297_v38 = vadd.f32 %v296_v37, %v268_v12 }
 0x2a3   :  { %299 = vst.msk [vmem:[#allocation2] sm:$0x1] %vm63_vm1, %v297_v38 }
 0x2aa   :  { %v344_v39 = vld [vmem:[#allocation2] ss:$0 sm:$0xff] }
 0x2ab   :  { %310 = vperm.xlu1 %351, %v344_v39  }
 0x32a   :  { %v311_v40 = vpop.permute.xlu1 %310 }
 0x32b   :  { %313 = vst [vmem:[#allocation3] sm:$0xff] %v311_v40 }
 0x32c   :  { %400 = shalt.err (!%p397_p4)
}
 0x32d   :  { %s401_s30 = scalar_lea.hbm %s600_s3, 128 }
 0x32e   :  { %p402_p5 = scmp.ne.s32.totalorder %s600_s3, %s401_s30  ;;  %p405_p6 = scmp.lt.u32.totalorder %s401_s30, %s600_s3 }
 0x330   :  { %p407_p7 = pnand %p405_p6, %p402_p5 }
 0x332   :  { %410 = shalt.err (!%p407_p7)
}
 0x333   :  { %323 = dma.vmem_to_hbm [thread:$0]  %s321_s26, 128, %s600_s3, [#allocation4]  }
 0x334   :  { %411 = dma.done.wait [#allocation4], 128  }
 0x335   :  { %412 = vsyncadd [#allocation4], 4294967168 }
 0x336   :  { %327 = vsyncpa [#allocation4], 1 }

</bundles_post_ra>
